<compile_context>
chip_gen: v5e
topology: v5e:2x2
jax: 0.10.0
libtpu: 0.0.40
codegen_flags: <defaults>
</compile_context>

<pallas_src>
import functools

import numpy as np
import jax
import jax.numpy as jnp
from jax.experimental import pallas as pl
from jax.experimental.pallas import tpu as pltpu


_VMEM_BUDGET_BYTES = 28 << 20   # conservative live-set budget (fits all gens)


# --------------------------------------------------------------------------- #
# Small helpers
# --------------------------------------------------------------------------- #
def _round_up(x, m):
    return ((x + m - 1) // m) * m


def _cdiv(a, b):
    return -(-a // b)


def _device_kind():
    try:
        return jax.devices()[0].device_kind.lower()
    except Exception:
        return ""


def _default_min_grid_steps():
    # v7x has 2 TensorCores per chip -> keep >= 2 grid steps (when the batch
    # allows) so the megacore can shard the "parallel" axis. v5e/v6e: 1 TC ->
    # single biggest tile.
    kind = _device_kind()
    return 2 if ("v7" in kind or "tpu7" in kind or "7x" in kind) else 1


def _default_mxu_tile():
    # MXU native tile: 128 on v5e, 256 on v6e/v7x.
    kind = _device_kind()
    if "v6" in kind or "v7" in kind or "tpu7" in kind or "7x" in kind:
        return 256
    return 128


_SINGLE_BUFFER_OK = None


def _single_buffer_supported():
    """Probe once whether pipeline_mode=pl.Buffered(1) works on this install."""
    global _SINGLE_BUFFER_OK
    if _SINGLE_BUFFER_OK is None:
        def _copy(c_ref, o_ref):
            o_ref[...] = c_ref[...]
        try:
            c = jnp.ones((8, 128), jnp.float32)
            out = pl.pallas_call(
                _copy,
                out_shape=jax.ShapeDtypeStruct((8, 256), jnp.float32),
                grid=(2,),
                in_specs=[pl.BlockSpec((8, 128), lambda i: (0, 0),
                                       pipeline_mode=pl.Buffered(1))],
                out_specs=pl.BlockSpec((8, 128), lambda i: (0, i)),
            )(c)
            jax.block_until_ready(out)
            _SINGLE_BUFFER_OK = bool(np.allclose(np.asarray(out), 1.0))
        except Exception:
            _SINGLE_BUFFER_OK = False
    return _SINGLE_BUFFER_OK


def _const_spec(arr, single_buffer):
    """Full-array BlockSpec for a grid-invariant (constant) operand."""
    nd = arr.ndim
    index_map = lambda i, _nd=nd: (0,) * _nd
    if single_buffer:
        return pl.BlockSpec(arr.shape, index_map, pipeline_mode=pl.Buffered(1))
    return pl.BlockSpec(arr.shape, index_map)


# --------------------------------------------------------------------------- #
# Parameter init / packing (torch semantics -> fused kernel weights)
# --------------------------------------------------------------------------- #
def _orthogonal(key, shape, gain):
    """Deterministic orthogonal init (same semantics as nn.init.orthogonal_)."""
    rows, cols = shape
    flat = jax.random.normal(key, (max(rows, cols), min(rows, cols)), jnp.float32)
    q, r = jnp.linalg.qr(flat)
    d = jnp.sign(jnp.diag(r))
    d = jnp.where(d == 0, 1.0, d)
    q = q * d
    if rows < cols:
        q = q.T
    return gain * q[:rows, :cols]


def init_q_c_net(key, state_n, action_n, net_width):
    """Torch-convention per-layer params: weight (out, in), bias (out,)."""
    keys = jax.random.split(key, 6)
    gain = float(np.sqrt(2.0))
    in_dim = state_n + action_n

    def lin(k, out_d, in_d):
        return _orthogonal(k, (out_d, in_d), gain), jnp.zeros((out_d,), jnp.float32)

    w11, b11 = lin(keys[0], net_width, in_dim)
    w12, b12 = lin(keys[1], net_width, net_width)
    w13, b13 = lin(keys[2], 1, net_width)
    w21, b21 = lin(keys[3], net_width, in_dim)
    w22, b22 = lin(keys[4], net_width, net_width)
    w23, b23 = lin(keys[5], 1, net_width)
    return (w11, b11, w12, b12, w13, b13,
            w21, b21, w22, b22, w23, b23)


def pack_params(torch_params, *, dtype=jnp.float32, mxu_tile=None):
    """Fuse the two heads into 3 kernel weights (batch-on-lanes orientation).

    dtype: operand dtype for weights/activations (bf16 recommended on v6e/v7x;
    accumulation stays f32 inside the kernel). Biases stay f32.
    """
    (w11, b11, w12, b12, w13, b13,
     w21, b21, w22, b22, w23, b23) = torch_params
    W = w11.shape[0]
    if mxu_tile is None:
        mxu_tile = _default_mxu_tile()

    w1 = jnp.concatenate([w11, w21], axis=0).astype(dtype)            # (2W, in_dim)
    b1 = jnp.concatenate([b11, b21]).reshape(2 * W, 1).astype(jnp.float32)

    if 2 * W <= mxu_tile:
        # Fused block-diagonal layer-2 weight: one MXU pass covers both heads.
        w2 = jnp.zeros((2 * W, 2 * W), jnp.float32)
        w2 = w2.at[:W, :W].set(w12).at[W:, W:].set(w22)
        w2 = w2.astype(dtype)                                          # (2W, 2W)
    else:
        # 2W exceeds the MXU native tile: keep layer-2 weights per head so we
        # do not spend MXU passes multiplying zero blocks.
        w2 = jnp.stack([w12, w22], axis=0).astype(dtype)               # (2, W, W)
    b2 = jnp.concatenate([b12, b22]).reshape(2 * W, 1).astype(jnp.float32)

    w3 = jnp.zeros((2, 2 * W), jnp.float32)                            # row0->Q1, row1->Q2
    w3 = w3.at[0:1, :W].set(w13).at[1:2, W:].set(w23)
    w3 = w3.astype(dtype)
    b3 = jnp.concatenate([b13, b23]).reshape(2, 1).astype(jnp.float32)

    return (w1, b1, w2, b2, w3, b3)


# --------------------------------------------------------------------------- #
# Kernel
# --------------------------------------------------------------------------- #
def _make_qcnet_kernel(split_layer2):
    def kernel(x_ref, w1_ref, b1_ref, w2_ref, b2_ref, w3_ref, b3_ref, out_ref):
        # Layer 1: y^T = W1 @ x^T (batch on lanes, f32 MXU accumulation).
        h = jnp.dot(w1_ref[...], x_ref[...], preferred_element_type=jnp.float32)
        h = jnp.maximum(h + b1_ref[...], 0.0)                 # (2W, tile_b), f32
        h = h.astype(w2_ref.dtype)
        if split_layer2:
            # Per-head (W, W) matmuls when the fused block-diagonal weight
            # would exceed the MXU native tile.
            W = w2_ref.shape[1]
            h1 = jnp.dot(w2_ref[0], h[:W, :], preferred_element_type=jnp.float32)
            h2 = jnp.dot(w2_ref[1], h[W:, :], preferred_element_type=jnp.float32)
            h = jnp.concatenate([h1, h2], axis=0)
        else:
            # Block-diagonal fused layer 2: one MXU pass for both heads.
            h = jnp.dot(w2_ref[...], h, preferred_element_type=jnp.float32)
        h = jnp.maximum(h + b2_ref[...], 0.0)                 # (2W, tile_b), f32
        h = h.astype(w3_ref.dtype)
        # Layer 3: one lane-dense (2, tile_b) store; row 0 = Q1, row 1 = Q2.
        out_ref[...] = (jnp.dot(w3_ref[...], h, preferred_element_type=jnp.float32)
                        + b3_ref[...]).astype(out_ref.dtype)
    return kernel


# --------------------------------------------------------------------------- #
# Forward (single jit: pad/transpose + pallas_call + slice all fuse)
# --------------------------------------------------------------------------- #
@functools.partial(jax.jit,
                   static_argnames=("max_tile_b", "min_grid_steps", "single_buffer"))
def _forward(state, action, params, *, max_tile_b, min_grid_steps, single_buffer):
    w1, b1, w2, b2, w3, b3 = params
    B, state_n = state.shape
    action_n = action.shape[1]
    in_dim = state_n + action_n
    two_w = w1.shape[0]
    op_dtype = w1.dtype
    itemsize = jnp.dtype(op_dtype).itemsize

    # ---- batch tile selection (batch lives on lanes) ------------------------
    b128 = _round_up(max(B, 1), 128)
    tile_b = min(max_tile_b, b128)
    if min_grid_steps > 1:
        # Split into balanced 128-multiple tiles so >=2 grid steps exist when
        # the batch is big enough (v7x megacore).
        balanced = _round_up(_cdiv(b128, min_grid_steps), 128)
        tile_b = max(128, min(tile_b, balanced))

    nbuf_w = 1 if single_buffer else 2
    w_bytes = nbuf_w * ((w1.size + w2.size + w3.size) * itemsize
                        + (b1.size + b2.size + b3.size) * 4)

    def vmem_estimate(tb):
        x_bytes = 2 * in_dim * tb * itemsize      # double-buffered input block
        out_bytes = 2 * 2 * tb * 4                # double-buffered output block
        act_bytes = 3 * two_w * tb * 4            # in-kernel f32 activations
        return x_bytes + out_bytes + act_bytes + w_bytes

    while tile_b > 128 and vmem_estimate(tile_b) > _VMEM_BUDGET_BYTES:
        tile_b = max(128, _round_up(tile_b // 2, 128))

    B_pad = _round_up(B, tile_b)
    grid = (B_pad // tile_b,)
    vmem_limit = int(min(48 << 20, max(32 << 20, vmem_estimate(tile_b) + (8 << 20))))

    # ---- fused input prep: one padded, transposed operand (one XLA copy) ----
    x = jnp.concatenate([state, action], axis=-1).astype(op_dtype)     # (B, in_dim)
    xt = jnp.pad(x.T, ((0, 0), (0, B_pad - B)))                        # (in_dim, B_pad)

    split_layer2 = (w2.ndim == 3)
    kernel = _make_qcnet_kernel(split_layer2)

    out = pl.pallas_call(
        kernel,
        out_shape=jax.ShapeDtypeStruct((2, B_pad), jnp.float32),
        grid_spec=pltpu.PrefetchScalarGridSpec(
            num_scalar_prefetch=0,
            grid=grid,
            in_specs=[
                pl.BlockSpec((in_dim, tile_b), lambda i: (0, i)),
                _const_spec(w1, single_buffer), _const_spec(b1, single_buffer),
                _const_spec(w2, single_buffer), _const_spec(b2, single_buffer),
                _const_spec(w3, single_buffer), _const_spec(b3, single_buffer),
            ],
            out_specs=pl.BlockSpec((2, tile_b), lambda i: (0, i)),
        ),
        compiler_params=pltpu.CompilerParams(
            dimension_semantics=("parallel",),
            vmem_limit_bytes=vmem_limit),
    )(xt, w1, b1, w2, b2, w3, b3)

    # Padded lanes (columns B..B_pad) carry ReLU(bias) garbage; slice them off
    # here inside the same jit so the epilogue fuses with the kernel output.
    q1 = out[0, :B].reshape(B, 1)
    q2 = out[1, :B].reshape(B, 1)
    return q1, q2


def q_c_net_forward(state, action, params, *, max_tile_b=2048,
                    min_grid_steps=None, single_buffer_weights=True):
    """Pallas implementation of Q_C_net.forward: returns (Q1, Q2), each (B, 1)."""
    if min_grid_steps is None:
        min_grid_steps = _default_min_grid_steps()
    single_buffer = bool(single_buffer_weights) and _single_buffer_supported()
    return _forward(state, action, params,
                    max_tile_b=int(max_tile_b),
                    min_grid_steps=int(min_grid_steps),
                    single_buffer=single_buffer)


# --------------------------------------------------------------------------- #
# Pure-JAX reference (mirrors the PyTorch module exactly)
# --------------------------------------------------------------------------- #
def _reference(state, action, torch_params):
    (w11, b11, w12, b12, w13, b13,
     w21, b21, w22, b22, w23, b23) = torch_params
    x = jnp.concatenate([state, action], axis=-1)

    def head(w1, b1, w2, b2, w3, b3):
        h = jnp.maximum(x @ w1.T + b1, 0.0)
        h = jnp.maximum(h @ w2.T + b2, 0.0)
        return h @ w3.T + b3

    return (head(w11, b11, w12, b12, w13, b13),
            head(w21, b21, w22, b22, w23, b23))


if __name__ == "__main__":
    state_n, action_n, net_width = 6, 2, 32
    batch = 16

    key = jax.random.PRNGKey(0)
    k_params, k_state, k_action = jax.random.split(key, 3)

    torch_params = init_q_c_net(k_params, state_n, action_n, net_width)
    state = jax.random.normal(k_state, (batch, state_n), jnp.float32)
    action = jax.random.normal(k_action, (batch, action_n), jnp.float32)

    r1, r2 = _reference(state, action, torch_params)

    # 1) f32 operands, fused block-diagonal layer 2 (default path).
    params_f32 = pack_params(torch_params, dtype=jnp.float32)
    q1, q2 = q_c_net_forward(state, action, params_f32)
    jax.block_until_ready((q1, q2))
    assert q1.shape == (batch, 1) and q2.shape == (batch, 1)
    np.testing.assert_allclose(np.asarray(q1), np.asarray(r1), rtol=1e-5, atol=1e-5)
    np.testing.assert_allclose(np.asarray(q2), np.asarray(r2), rtol=1e-5, atol=1e-5)

    # 2) f32 operands, forced per-head layer-2 split (exercises the wide-net path).
    params_split = pack_params(torch_params, dtype=jnp.float32, mxu_tile=32)
    q1s, q2s = q_c_net_forward(state, action, params_split)
    jax.block_until_ready((q1s, q2s))
    np.testing.assert_allclose(np.asarray(q1s), np.asarray(r1), rtol=1e-5, atol=1e-5)
    np.testing.assert_allclose(np.asarray(q2s), np.asarray(r2), rtol=1e-5, atol=1e-5)

    # 3) bf16 operands (f32 MXU accumulation + f32 bias/ReLU) — looser tolerance.
    params_bf16 = pack_params(torch_params, dtype=jnp.bfloat16)
    q1b, q2b = q_c_net_forward(state, action, params_bf16)
    jax.block_until_ready((q1b, q2b))
    np.testing.assert_allclose(np.asarray(q1b), np.asarray(r1), rtol=5e-2, atol=5e-2)
    np.testing.assert_allclose(np.asarray(q2b), np.asarray(r2), rtol=5e-2, atol=5e-2)

    print("KERNEL_OK")
</pallas_src>

<mosaic_0001>
module attributes {stable_mosaic.version = 11 : i64} {
  func.func @_copy(%arg0: i32, %arg1: memref<8x128xf32, #tpu.memory_space<vmem>>, %arg2: memref<8x128xf32, #tpu.memory_space<vmem>>) attributes {dimension_semantics = [#tpu.dimension_semantics<arbitrary>], iteration_bounds = array<i64: 2>, scalar_prefetch = 0 : i64, scratch_operands = 0 : i64, tpu.core_type = #tpu.core_type<tc>, window_params = [{pipeline_mode = #tpu.pipeline_mode<synchronous>, transform_indices = @transform_0, window_bounds = array<i64: 8, 128>}, {transform_indices = @transform_1, window_bounds = array<i64: 8, 128>}]} {
    %c0 = arith.constant 0 : index
    %c0_0 = arith.constant 0 : index
    %0 = vector.load %arg1[%c0, %c0_0] : memref<8x128xf32, #tpu.memory_space<vmem>>, vector<8x128xf32>
    %c0_1 = arith.constant 0 : index
    %c0_2 = arith.constant 0 : index
    %1 = vector.load %arg2[%c0_1, %c0_2] : memref<8x128xf32, #tpu.memory_space<vmem>>, vector<8x128xf32>
    tpu.vector_store %arg2[%c0_1, %c0_2], %0 {strides = array<i32>} : memref<8x128xf32, #tpu.memory_space<vmem>>, vector<8x128xf32>,
    return
  }
  func.func @transform_0(%arg0: i32) -> (i32, i32) {
    %c0_i32 = arith.constant 0 : i32
    %c0_i32_0 = arith.constant 0 : i32
    %c0_i32_1 = arith.constant 0 : i32
    return %c0_i32, %c0_i32_0 : i32, i32
  }
  func.func @transform_1(%arg0: i32) -> (i32, i32) {
    %c0_i32 = arith.constant 0 : i32
    %c0_i32_0 = arith.constant 0 : i32
    return %c0_i32, %arg0 : i32, i32
  }
}

module attributes {stable_mosaic.version = 11 : i64} {
  func.func @kernel(%arg0: i32, %arg1: memref<8x128xf32, #tpu.memory_space<vmem>>, %arg2: memref<64x8xf32, #tpu.memory_space<vmem>>, %arg3: memref<64x1xf32, #tpu.memory_space<vmem>>, %arg4: memref<64x64xf32, #tpu.memory_space<vmem>>, %arg5: memref<64x1xf32, #tpu.memory_space<vmem>>, %arg6: memref<2x64xf32, #tpu.memory_space<vmem>>, %arg7: memref<2x1xf32, #tpu.memory_space<vmem>>, %arg8: memref<2x128xf32, #tpu.memory_space<vmem>>) attributes {dimension_semantics = [#tpu.dimension_semantics<parallel>], iteration_bounds = array<i64: 1>, scalar_prefetch = 0 : i64, scratch_operands = 0 : i64, tpu.core_type = #tpu.core_type<tc>, window_params = [{transform_indices = @transform_0, window_bounds = array<i64: 8, 128>}, {pipeline_mode = #tpu.pipeline_mode<synchronous>, transform_indices = @transform_1, window_bounds = array<i64: 64, 8>}, {pipeline_mode = #tpu.pipeline_mode<synchronous>, transform_indices = @transform_2, window_bounds = array<i64: 64, 1>}, {pipeline_mode = #tpu.pipeline_mode<synchronous>, transform_indices = @transform_3, window_bounds = array<i64: 64, 64>}, {pipeline_mode = #tpu.pipeline_mode<synchronous>, transform_indices = @transform_4, window_bounds = array<i64: 64, 1>}, {pipeline_mode = #tpu.pipeline_mode<synchronous>, transform_indices = @transform_5, window_bounds = array<i64: 2, 64>}, {pipeline_mode = #tpu.pipeline_mode<synchronous>, transform_indices = @transform_6, window_bounds = array<i64: 2, 1>}, {transform_indices = @transform_7, window_bounds = array<i64: 2, 128>}]} {
    %c0 = arith.constant 0 : index
    %c0_0 = arith.constant 0 : index
    %0 = vector.load %arg2[%c0, %c0_0] : memref<64x8xf32, #tpu.memory_space<vmem>>, vector<64x8xf32>
    %c0_1 = arith.constant 0 : index
    %c0_2 = arith.constant 0 : index
    %1 = vector.load %arg1[%c0_1, %c0_2] : memref<8x128xf32, #tpu.memory_space<vmem>>, vector<8x128xf32>
    %cst = arith.constant dense<0.000000e+00> : vector<64x128xf32>
    %2 = tpu.matmul %0, %1, %cst {dimension_numbers = #tpu.dot_dimension_numbers<[1], [0], [0], [1], [0, 0, 1, 1], [], []>} : vector<64x8xf32>, vector<8x128xf32>, vector<64x128xf32> -> vector<64x128xf32>
    %c0_3 = arith.constant 0 : index
    %c0_4 = arith.constant 0 : index
    %3 = vector.load %arg3[%c0_3, %c0_4] : memref<64x1xf32, #tpu.memory_space<vmem>>, vector<64x1xf32>
    %4 = vector.broadcast %3 : vector<64x1xf32> to vector<64x128xf32>
    %5 = arith.addf %2, %4 : vector<64x128xf32>
    %cst_5 = arith.constant 0.000000e+00 : f32
    %6 = vector.broadcast %cst_5 : f32 to vector<64x128xf32>
    %7 = arith.maximumf %5, %6 : vector<64x128xf32>
    %c0_6 = arith.constant 0 : index
    %c0_7 = arith.constant 0 : index
    %8 = vector.load %arg4[%c0_6, %c0_7] : memref<64x64xf32, #tpu.memory_space<vmem>>, vector<64x64xf32>
    %cst_8 = arith.constant dense<0.000000e+00> : vector<64x128xf32>
    %9 = tpu.matmul %8, %7, %cst_8 {dimension_numbers = #tpu.dot_dimension_numbers<[1], [0], [0], [1], [0, 0, 1, 1], [], []>} : vector<64x64xf32>, vector<64x128xf32>, vector<64x128xf32> -> vector<64x128xf32>
    %c0_9 = arith.constant 0 : index
    %c0_10 = arith.constant 0 : index
    %10 = vector.load %arg5[%c0_9, %c0_10] : memref<64x1xf32, #tpu.memory_space<vmem>>, vector<64x1xf32>
    %11 = vector.broadcast %10 : vector<64x1xf32> to vector<64x128xf32>
    %12 = arith.addf %9, %11 : vector<64x128xf32>
    %cst_11 = arith.constant 0.000000e+00 : f32
    %13 = vector.broadcast %cst_11 : f32 to vector<64x128xf32>
    %14 = arith.maximumf %12, %13 : vector<64x128xf32>
    %c0_12 = arith.constant 0 : index
    %c0_13 = arith.constant 0 : index
    %15 = vector.load %arg6[%c0_12, %c0_13] : memref<2x64xf32, #tpu.memory_space<vmem>>, vector<2x64xf32>
    %cst_14 = arith.constant dense<0.000000e+00> : vector<2x128xf32>
    %16 = tpu.matmul %15, %14, %cst_14 {dimension_numbers = #tpu.dot_dimension_numbers<[1], [0], [0], [1], [0, 0, 1, 1], [], []>} : vector<2x64xf32>, vector<64x128xf32>, vector<2x128xf32> -> vector<2x128xf32>
    %c0_15 = arith.constant 0 : index
    %c0_16 = arith.constant 0 : index
    %17 = vector.load %arg7[%c0_15, %c0_16] : memref<2x1xf32, #tpu.memory_space<vmem>>, vector<2x1xf32>
    %18 = vector.broadcast %17 : vector<2x1xf32> to vector<2x128xf32>
    %19 = arith.addf %16, %18 : vector<2x128xf32>
    %c0_17 = arith.constant 0 : index
    %c0_18 = arith.constant 0 : index
    %20 = vector.load %arg8[%c0_17, %c0_18] : memref<2x128xf32, #tpu.memory_space<vmem>>, vector<2x128xf32>
    tpu.vector_store %arg8[%c0_17, %c0_18], %19 {strides = array<i32>} : memref<2x128xf32, #tpu.memory_space<vmem>>, vector<2x128xf32>,
    return
  }
  func.func @transform_0(%arg0: i32) -> (i32, i32) {
    %c0_i32 = arith.constant 0 : i32
    %c0_i32_0 = arith.constant 0 : i32
    return %c0_i32, %arg0 : i32, i32
  }
  func.func @transform_1(%arg0: i32) -> (i32, i32) {
    %c0_i32 = arith.constant 0 : i32
    %c0_i32_0 = arith.constant 0 : i32
    %c0_i32_1 = arith.constant 0 : i32
    return %c0_i32, %c0_i32_0 : i32, i32
  }
  func.func @transform_2(%arg0: i32) -> (i32, i32) {
    %c0_i32 = arith.constant 0 : i32
    %c0_i32_0 = arith.constant 0 : i32
    %c0_i32_1 = arith.constant 0 : i32
    return %c0_i32, %c0_i32_0 : i32, i32
  }
  func.func @transform_3(%arg0: i32) -> (i32, i32) {
    %c0_i32 = arith.constant 0 : i32
    %c0_i32_0 = arith.constant 0 : i32
    %c0_i32_1 = arith.constant 0 : i32
    return %c0_i32, %c0_i32_0 : i32, i32
  }
  func.func @transform_4(%arg0: i32) -> (i32, i32) {
    %c0_i32 = arith.constant 0 : i32
    %c0_i32_0 = arith.constant 0 : i32
    %c0_i32_1 = arith.constant 0 : i32
    return %c0_i32, %c0_i32_0 : i32, i32
  }
  func.func @transform_5(%arg0: i32) -> (i32, i32) {
    %c0_i32 = arith.constant 0 : i32
    %c0_i32_0 = arith.constant 0 : i32
    %c0_i32_1 = arith.constant 0 : i32
    return %c0_i32, %c0_i32_0 : i32, i32
  }
  func.func @transform_6(%arg0: i32) -> (i32, i32) {
    %c0_i32 = arith.constant 0 : i32
    %c0_i32_0 = arith.constant 0 : i32
    %c0_i32_1 = arith.constant 0 : i32
    return %c0_i32, %c0_i32_0 : i32, i32
  }
  func.func @transform_7(%arg0: i32) -> (i32, i32) {
    %c0_i32 = arith.constant 0 : i32
    %c0_i32_0 = arith.constant 0 : i32
    return %c0_i32, %arg0 : i32, i32
  }
}

</mosaic_0001>

<bundles_post_ra>
// kernel: tpu_custom_call.1
= control target key start
LH: loop header
LB: loop body
LE: loop exit
PB: predicated region body
PF: predicated region fallthrough
CT: control target
= control target key end

     0   :  { %6 = vsyncpa [#allocation3], 0  ;;  %s440_s0 = inlined_call_operand.hbm [shape: f32[8,128], index: 0, kind: input, shape index: {}]   ;;  %s441_s1 = inlined_call_operand.hbm [shape: f32[8,256], index: 1, kind: output, shape index: {}]  }
   0x1   :  { %7 = vsyncpa [#allocation4], 0 }
   0x2   :  { %9 = vsyncpa [#allocation4 + $0x1], 0  ;;  %s356_s6 = smov 0   ;;  %s358_s7 = smov 0  }
   0x3   :  { %s360_s8 = smov 0   ;;  %s362_s9 = smov 0  }
   0x4 LB: > { %s377_s10 = sadd.s32 4294967295, %s343_s9   ;;  %s187_s11 = sadd.s32 4294967294, %s343_s9   ;;  %s343_s9 = sphi %s362_s9, %s447_s9   ;;  %s339_s8 = sphi %s360_s8, %s446_s8   ;;  %s335_s7 = sphi %s358_s7, %s445_s7   ;;  %s331_s6 = sphi %s356_s6, %s444_s6  }
   0x5   : > { %s381_s12 = sadd.s32 1, %s343_s9   ;;  %s43_s13 = sadd.s32 1, %s339_s8 }
   0x6   : > { %s40_s14 = ssub.s32 %s343_s9, %s381_s12  ;;  %p53_p0 = scmp.ne.s32.totalorder %s339_s8, %s335_s7 }
   0x7   : > { %p41_p1 = scmp.eq.s32.totalorder %s40_s14, 0  ;;  %p54_p2 = scmp.eq.s32.totalorder %s377_s10, 1 }
   0x8   : > { %p59_p3 = scmp.ne.s32.totalorder %s335_s7, %s331_s6  ;;  %p60_p4 = scmp.eq.s32.totalorder %s187_s11, 1 }
   0x9   : > { %s392_s15 = scalar_select %p41_p1, %s339_s8, %s43_s13  }
   0xa   : > { %p394_p5 = por %p54_p2, %p53_p0  ;;  %p398_p6 = por %p60_p4, %p59_p3 }
   0xb   : > { %p188_p7 = scmp.ge.s32.totalorder %s343_s9, 1  ;;  %p67_p8 = scmp.lt.s32.totalorder %s343_s9, 3 }
   0xc   : > { %p211_p9 = scmp.eq.s32.totalorder %s377_s10, 0  ;;  %s79_s20 = sshll.u32 %s440_s0, 4  ;;  %s80_s20 = int_to_ptr.hbm [resolvable:$true] %s79_s20 }
   0xd   : > { %p68_p10 = pnand %p188_p7, %p67_p8  ;;  %s345_s21 = smov [#allocation2]  }
   0xe   : > { %s81_s22 = sshll.u32 %s345_s21, 4  ;;  %s82_s22 = int_to_ptr.vmem [resolvable:$true] %s81_s22 }
   0xf   : > { %p203_p11 = pneg %p68_p10  ;;  %94 = sbr.rel (%p68_p10) target bundleno = 37 (0x25), region = 24 }
  0x11   : > { %p204_p12 = pnand %p211_p9, %p203_p11 }
  0x13   : > { %206 = dma.hbm_to_vmem [thread:$0]  (!%p204_p12), %s80_s20, 128, %s82_s22, [#allocation3]  }
  0x14   : > { %322 = dma.done.wait (%p211_p9), [#allocation3], 128  }
  0x15   : > { %324 = vsyncadd (%p211_p9), [#allocation3], 4294967168  ;;  %s107_s23 = sand.u32 1, %s335_s7   ;;  %s194_s24 = sshll.u32 %s377_s10, 3  ;;  %v110_v0 = vld [vmem:[#allocation2] sm:$0xff] }
  0x16   : > { %s192_s25 = sshll.u32 %s107_s23, 3  ;;  %s123_s28 = scalar_lea.hbm %s441_s1, %s194_s24 }
  0x17   : > { %s109_s29 = scalar_lea.vmem [#allocation5], %s192_s25  ;;  %s127_s2 = sshll.u32 %s123_s28, 4  ;;  %s128_s2 = int_to_ptr.hbm [resolvable:$true] %s127_s2 }
  0x18   : > { %s125_s30 = sshll.u32 %s109_s29, 4  ;;  %111 = vst [vmem:[%s109_s29] sm:$0xff] %v110_v0  ;;  %s113_s3 = scalar_lea.sflag [#allocation4], %s107_s23  ;;  %s126_s30 = int_to_ptr.vmem [resolvable:$true] %s125_s30 }
  0x19   : > { %s291_s4 = sshra.s32 %s128_s2, 4  ;;  %s297_s13 = scalar_lea.hbm %s441_s1, 16  ;;  %s292_s4 = int_to_ptr.hbm [resolvable:$true] %s291_s4 }
  0x1a   : > { %s293_s5 = scalar_lea.hbm %s292_s4, 8  ;;  %p298_p2 = scmp.lt.s32.totalorder %s292_s4, %s441_s1 }
  0x1b   : > { %p294_p13 = scmp.ne.s32.totalorder %s292_s4, %s293_s5  ;;  %p299_p3 = scmp.lt.s32.totalorder %s297_s13, %s293_s5 }
  0x1d   : > { %p295_p0 = pnand %p294_p13, %p394_p5  ;;  %p300_p4 = por %p299_p3, %p298_p2 }
  0x1f   : > { %p296_p1 = pneg %p295_p0 }
  0x21   : > { %p301_p7 = pnand %p300_p4, %p296_p1 }
  0x23   : > { %304 = shalt.err (!%p301_p7)
}
  0x24   : > { %201 = dma.vmem_to_hbm [thread:$0]  (%p394_p5), %s126_s30, 128, %s128_s2, %s113_s3  }
  0x25 PF: > { %p213_p8 = scmp.ge.s32.totalorder %s343_s9, 2  ;;  %s139_s19 = sand.u32 1, %s331_s6  }
  0x26   : > { %s140_s20 = scalar_lea.sflag [#allocation4], %s139_s19 }
  0x27   : > { %p208_p9 = pnand %p213_p8, %p398_p6 }
  0x29   : > { %p209_p10 = pneg %p208_p9 }
  0x2b   : > { %326 = dma.done.wait (%p209_p10), %s140_s20, 128  }
  0x2c   : > { %328 = vsyncadd (%p209_p10), %s140_s20, 4294967168  ;;  %p12_p11 = scmp.ge.s32.totalorder %s381_s12, 4   ;;  %s444_s6 = smov %s335_s7 }
  0x2d   : > { %s445_s7 = smov %s339_s8  ;;  %s446_s8 = smov %s392_s15 }
  0x2e   : > { %s447_s9 = smov %s381_s12  ;;  %14 = sbr.rel (!%p12_p11) target bundleno = 4 (0x4), region = 61 }
  0x33   :  { %146 = vsyncpa [#allocation3], 1 }
  0x34   :  { %148 = vsyncpa [#allocation3 + $0x1], 1 }
  0x35   :  { %149 = vsyncpa [#allocation4], 1 }
  0x36   :  { %151 = vsyncpa [#allocation4 + $0x1], 1 }

// kernel: _forward.1
= control target key start
LH: loop header
LB: loop body
LE: loop exit
PB: predicated region body
PF: predicated region fallthrough
CT: control target
= control target key end

     0   :  { %vm83_vm0 = vcmask 64512   ;;  %v352_v0 = vmov 0   ;;  %vm213_vm1 = vcmask 523264   ;;  %s518_s2 = inlined_call_operand.vmem [shape: f32[64,1], index: 2, kind: input, shape index: {}]   ;;  %s519_s0 = inlined_call_operand.vmem [shape: f32[8,128], index: 0, kind: input, shape index: {}]   ;;  %s520_s1 = inlined_call_operand.vmem [shape: f32[64,8], index: 1, kind: input, shape index: {}]   ;;  %s521_s4 = inlined_call_operand.vmem [shape: f32[64,1], index: 4, kind: input, shape index: {}]   ;;  %s522_s6 = inlined_call_operand.vmem [shape: f32[2,1], index: 6, kind: input, shape index: {}]   ;;  %s523_s3 = inlined_call_operand.vmem [shape: f32[64,64], index: 3, kind: input, shape index: {}]   ;;  %s524_s5 = inlined_call_operand.vmem [shape: f32[2,64], index: 5, kind: input, shape index: {}]   ;;  %s525_s7 = inlined_call_operand.vmem [shape: f32[2,128], index: 7, kind: output, shape index: {}]  }
   0x1   :  { %350 = vset.pattern.permute.xlu1 %v352_v0  ;;  %v40_v1 = vld [vmem:[%s518_s2 + $0x28] sm:$0xff]  ;;  %v34_v2 = vld [vmem:[%s519_s0] sm:$0xff]  ;;  %349 = vset.pattern.permute.xlu0 %v352_v0  ;;  %v42_v4 = vld [vmem:[%s518_s2 + $0x38] sm:$0xff] }
   0x2   :  { %v26_v3 = vld [vmem:[%s520_s1] sm:$0xff]  ;;  %70 = vperm.xlu1 %350, %v40_v1   ;;  %123 = vmatpush.msra.mxu0 %v34_v2  ;;  %v32_v5 = vld [vmem:[%s520_s1 + $0x30] sm:$0xff]  ;;  %v27_v7 = vld [vmem:[%s520_s1 + $0x8] sm:$0xff] }
   0x3   :  { %322 = vmatmul.msk.f32.vlgmr.msra.gmra.mxu0 %vm83_vm0, %v26_v3  ;;  %80 = vperm.xlu0 %349, %v42_v4   ;;  %v39_v6 = vld [vmem:[%s518_s2 + $0x20] sm:$0xff]  ;;  %v41_v8 = vld [vmem:[%s518_s2 + $0x30] sm:$0xff]  ;;  %v33_v9 = vld [vmem:[%s520_s1 + $0x38] sm:$0xff] }
   0x4   :  { %339 = vmatpush.msra.mxu2 %v34_v2  ;;  %351 = vset.pattern.permute.xlu2 %v352_v0  ;;  %v38_v10 = vld [vmem:[%s518_s2 + $0x18] sm:$0xff]  ;;  %v35_v11 = vld [vmem:[%s518_s2] sm:$0xff]  ;;  %v28_v12 = vld [vmem:[%s520_s1 + $0x10] sm:$0xff] }
   0x5   :  { %328 = vmatmul.msk.f32.vlgmr.msra.gmra.mxu2 %vm83_vm0, %v32_v5  ;;  %60 = vperm.xlu2 %351, %v38_v10   ;;  %v36_v13 = vld [vmem:[%s518_s2 + $0x8] sm:$0xff]  ;;  %v37_v14 = vld [vmem:[%s518_s2 + $0x10] sm:$0xff]  ;;  %v29_v16 = vld [vmem:[%s520_s1 + $0x18] sm:$0xff] }
   0x6   :  { %v170_v15 = vld [vmem:[%s521_s4 + $0x28] sm:$0xff]  ;;  %v171_v17 = vld [vmem:[%s521_s4 + $0x30] sm:$0xff]  ;;  %v172_v18 = vld [vmem:[%s521_s4 + $0x38] sm:$0xff] }
   0x7   :  { %v167_v19 = vld [vmem:[%s521_s4 + $0x10] sm:$0xff]  ;;  %v30_v20 = vld [vmem:[%s520_s1 + $0x20] sm:$0xff]  ;;  %v168_v21 = vld [vmem:[%s521_s4 + $0x18] sm:$0xff] }
   0x8   :  { %v169_v22 = vld [vmem:[%s521_s4 + $0x20] sm:$0xff]  ;;  %v31_v24 = vld [vmem:[%s520_s1 + $0x28] sm:$0xff]  ;;  %v159_v63 = vld [vmem:[%s523_s3 + $0x10] sm:$0xff] }
   0x9   :  { %v288_v23 = vld [vmem:[%s522_s6] sm:$0x3]  ;;  %v166_v26 = vld [vmem:[%s521_s4 + $0x8] sm:$0xff]  ;;  %v163_v0 = vld [vmem:[%s523_s3 + $0x30] sm:$0xff] }
   0xa   :  { %65 = vperm.xlu1 %350, %v39_v6   ;;  %v165_v25 = vld [vmem:[%s521_s4] sm:$0xff]  ;;  %v158_v61 = vld [vmem:[%s523_s3 + $0x8] sm:$0xff]  ;;  %v160_v1 = vld [vmem:[%s523_s3 + $0x18] sm:$0xff] }
   0xb   :  { %323 = vmatmul.msk.f32.gmra.mxu0 %vm83_vm0, %v27_v7  ;;  %75 = vperm.xlu0 %349, %v41_v8   ;;  %v157_v59 = vld [vmem:[%s523_s3] sm:$0xff]  ;;  %v162_v62 = vld [vmem:[%s523_s3 + $0x28] sm:$0xff]  ;;  %v164_v2 = vld [vmem:[%s523_s3 + $0x38] sm:$0xff] }
   0xc   :  { %v161_v60 = vld [vmem:[%s523_s3 + $0x20] sm:$0xff] }
   0xd   :  { %329 = vmatmul.msk.f32.gmra.mxu2 %vm83_vm0, %v33_v9  ;;  %55 = vperm.xlu2 %351, %v37_v14  }
  0x12   :  { %45 = vperm.xlu1 %350, %v35_v11  }
  0x13   :  { %324 = vmatmul.msk.f32.gmra.mxu0 %vm83_vm0, %v28_v12  ;;  %50 = vperm.xlu0 %349, %v36_v13  }
  0x15   :  { %210 = vperm.xlu2 %351, %v172_v18  }
  0x1a   :  { %200 = vperm.xlu1 %350, %v170_v15  }
  0x1b   :  { %325 = vmatmul.msk.f32.gmra.mxu0 %vm83_vm0, %v29_v16  ;;  %205 = vperm.xlu0 %349, %v171_v17  }
  0x1d   :  { %195 = vperm.xlu2 %351, %v169_v22  }
  0x22   :  { %185 = vperm.xlu1 %350, %v167_v19  }
  0x23   :  { %326 = vmatmul.msk.f32.gmra.mxu0 %vm83_vm0, %v30_v20  ;;  %190 = vperm.xlu0 %349, %v168_v21  }
  0x25   :  { %180 = vperm.xlu2 %351, %v166_v26  }
  0x2a   :  { %291 = vperm.xlu1 %350, %v288_v23  }
  0x2b   :  { %327 = vmatmul.msk.f32.gmra.mxu0 %vm83_vm0, %v31_v24  ;;  %175 = vperm.xlu0 %349, %v165_v25  }
  0x5f   :  { %v61_v41 = vpop.permute.xlu2 %60 }
  0x67   :  { %v56_v48 = vpop.permute.xlu2 %55 }
  0x6f   :  { %v211_v7 = vpop.permute.xlu2 %210 }
  0x74   :  { %v71_v39 = vpop.permute.xlu1 %70 }
  0x75   :  { %v81_v28 = vpop.permute.xlu0 %80 }
  0x77   :  { %v196_v12 = vpop.permute.xlu2 %195 }
  0x7c   :  { %v66_v42 = vpop.permute.xlu1 %65 }
  0x7d   :  { %v76_v31 = vpop.permute.xlu0 %75 }
  0x80   :  { %v125_v27 = vpop.f32.mrf.mxu0 }
  0x84   :  { %v46_v51 = vpop.permute.xlu1 %45 }
  0x85   :  { %v51_v52 = vpop.permute.xlu0 %50  ;;  %v126_v55 = vadd.f32 %v125_v27, %v46_v51  ;;  %v181_v27 = vpop.permute.xlu2 %180 }
  0x87   :  { %v149_v58 = vmax.f32 %v126_v55, 0.0 }
  0x88   :  { %v128_v29 = vpop.f32.mrf.mxu0  ;;  %v143_v30 = vpop.f32.mrf.mxu2 }
  0x89   :  { %v144_v32 = vadd.f32 %v143_v30, %v76_v31  ;;  %v129_v53 = vadd.f32 %v128_v29, %v51_v52 }
  0x8b   :  { %v155_v36 = vmax.f32 %v144_v32, 0.0  ;;  %v150_v57 = vmax.f32 %v129_v53, 0.0 }
  0x8c   :  { %v201_v11 = vpop.permute.xlu1 %200 }
  0x8d   :  { %v206_v8 = vpop.permute.xlu0 %205 }
  0x90   :  { %v131_v33 = vpop.f32.mrf.mxu0  ;;  %v146_v34 = vpop.f32.mrf.mxu2 }
  0x91   :  { %v147_v35 = vadd.f32 %v146_v34, %v81_v28  ;;  %v132_v49 = vadd.f32 %v131_v33, %v56_v48 }
  0x93   :  { %v156_v37 = vmax.f32 %v147_v35, 0.0  ;;  %v151_v56 = vmax.f32 %v132_v49, 0.0  ;;  %v287_v35 = vld [vmem:[%s524_s5] sm:$0x3] }
  0x94   :  { %v186_v24 = vpop.permute.xlu1 %185 }
  0x95   :  { %246 = vmatpush.msra.mxu1 %v156_v37  ;;  %340 = vmatpush.msra.mxu3 %v156_v37  ;;  %v191_v16 = vpop.permute.xlu0 %190 }
  0x97   :  { %247 = vmatpush.msra.mxu1 %v155_v36  ;;  %341 = vmatpush.msra.mxu3 %v155_v36 }
  0x98   :  { %v134_v38 = vpop.f32.mrf.mxu0 }
  0x99   :  { %v135_v46 = vadd.f32 %v134_v38, %v61_v41 }
  0x9b   :  { %v152_v54 = vmax.f32 %v135_v46, 0.0 }
  0x9c   :  { %v292_v36 = vpop.permute.xlu1 %291 }
  0x9d   :  { %v176_v30 = vpop.permute.xlu0 %175 }
  0xa0   :  { %v137_v40 = vpop.f32.mrf.mxu0 }
  0xa1   :  { %v138_v44 = vadd.f32 %v137_v40, %v66_v42 }
  0xa3   :  { %v153_v50 = vmax.f32 %v138_v44, 0.0 }
  0xa8   :  { %v140_v43 = vpop.f32.mrf.mxu0 }
  0xa9   :  { %v141_v45 = vadd.f32 %v140_v43, %v71_v39 }
  0xab   :  { %v154_v47 = vmax.f32 %v141_v45, 0.0 }
  0xad   :  { %248 = vmatpush.msra.mxu1 %v154_v47  ;;  %342 = vmatpush.msra.mxu3 %v154_v47 }
  0xaf   :  { %249 = vmatpush.msra.mxu1 %v153_v50  ;;  %343 = vmatpush.msra.mxu3 %v153_v50 }
  0xb1   :  { %250 = vmatpush.msra.mxu1 %v152_v54  ;;  %344 = vmatpush.msra.mxu3 %v152_v54 }
  0xb3   :  { %251 = vmatpush.msra.mxu1 %v151_v56  ;;  %345 = vmatpush.msra.mxu3 %v151_v56 }
  0xb5   :  { %252 = vmatpush.msra.mxu1 %v150_v57  ;;  %346 = vmatpush.msra.mxu3 %v150_v57 }
  0xb7   :  { %253 = vmatpush.msra.mxu1 %v149_v58  ;;  %347 = vmatpush.msra.mxu3 %v149_v58 }
  0xb8   :  { %330 = vmatmul.msk.f32.vlgmr.msra.gmra.mxu1 %vm213_vm1, %v157_v59  ;;  %334 = vmatmul.msk.f32.vlgmr.msra.gmra.mxu3 %vm213_vm1, %v161_v60 }
  0xc0   :  { %331 = vmatmul.msk.f32.gmra.mxu1 %vm213_vm1, %v158_v61  ;;  %335 = vmatmul.msk.f32.gmra.mxu3 %vm213_vm1, %v162_v62 }
  0xc8   :  { %332 = vmatmul.msk.f32.gmra.mxu1 %vm213_vm1, %v159_v63  ;;  %336 = vmatmul.msk.f32.gmra.mxu3 %vm213_vm1, %v163_v0 }
  0xd0   :  { %333 = vmatmul.msk.f32.gmra.mxu1 %vm213_vm1, %v160_v1  ;;  %337 = vmatmul.msk.f32.gmra.mxu3 %vm213_vm1, %v164_v2 }
 0x135   :  { %v255_v3 = vpop.f32.mrf.mxu1 }
 0x136   :  { %v256_v31 = vadd.f32 %v255_v3, %v176_v30 }
 0x138   :  { %v279_v34 = vmax.f32 %v256_v31, 0.0 }
 0x13b   :  { %v267_v4 = vpop.f32.mrf.mxu3 }
 0x13c   :  { %v268_v20 = vadd.f32 %v267_v4, %v196_v12 }
 0x13d   :  { %v258_v5 = vpop.f32.mrf.mxu1 }
 0x13e   :  { %v283_v25 = vmax.f32 %v268_v20, 0.0  ;;  %v259_v28 = vadd.f32 %v258_v5, %v181_v27 }
 0x140   :  { %v280_v33 = vmax.f32 %v259_v28, 0.0 }
 0x143   :  { %v270_v6 = vpop.f32.mrf.mxu3 }
 0x144   :  { %v271_v17 = vadd.f32 %v270_v6, %v201_v11 }
 0x145   :  { %v261_v10 = vpop.f32.mrf.mxu1 }
 0x146   :  { %v284_v22 = vmax.f32 %v271_v17, 0.0  ;;  %v262_v26 = vadd.f32 %v261_v10, %v186_v24 }
 0x148   :  { %v281_v32 = vmax.f32 %v262_v26, 0.0 }
 0x14b   :  { %v273_v9 = vpop.f32.mrf.mxu3 }
 0x14c   :  { %v274_v14 = vadd.f32 %v273_v9, %v206_v8 }
 0x14d   :  { %v264_v19 = vpop.f32.mrf.mxu1 }
 0x14e   :  { %v285_v21 = vmax.f32 %v274_v14, 0.0  ;;  %v265_v23 = vadd.f32 %v264_v19, %v191_v16 }
 0x150   :  { %v282_v29 = vmax.f32 %v265_v23, 0.0 }
 0x153   :  { %v276_v13 = vpop.f32.mrf.mxu3 }
 0x154   :  { %v277_v15 = vadd.f32 %v276_v13, %v211_v7 }
 0x156   :  { %v286_v18 = vmax.f32 %v277_v15, 0.0 }
 0x158   :  { %305 = vmatpush.msrb.mxu2 %v286_v18 }
 0x15a   :  { %306 = vmatpush.msrb.mxu2 %v285_v21 }
 0x15c   :  { %307 = vmatpush.msrb.mxu2 %v284_v22 }
 0x15e   :  { %308 = vmatpush.msrb.mxu2 %v283_v25 }
 0x160   :  { %309 = vmatpush.msrb.mxu2 %v282_v29 }
 0x162   :  { %310 = vmatpush.msrb.mxu2 %v281_v32 }
 0x164   :  { %311 = vmatpush.msrb.mxu2 %v280_v33 }
 0x166   :  { %312 = vmatpush.msrb.mxu2 %v279_v34 }
 0x167   :  { %338 = vmatmul.msk.f32.vlgmr.msrb.gmra.mxu2 %vm213_vm1, %v287_v35 }
 0x1ea   :  { %v314_v37 = vpop.f32.mrf.mxu2 }
 0x1eb   :  { %v315_v38 = vadd.f32 %v314_v37, %v292_v36 }
 0x1ed   :  { %317 = vst [vmem:[%s525_s7] sm:$0x3] %v315_v38 }

</bundles_post_ra>
